<compile_context>
chip_gen: v5e
topology: v5e:2x2
jax: 0.10.0
libtpu: 0.0.40
codegen_flags: <defaults>
</compile_context>

<pallas_src>
import jax
import jax.numpy as jnp
from jax.experimental import pallas as pl
from jax.experimental.pallas import tpu as pltpu


# ----------------------------------------------------------------------------
# Pallas kernels
# ----------------------------------------------------------------------------
def _conv_pool_kernel(p0_ref, p1_ref, p2_ref, p3_ref, w_ref, b_ref, o_ref):
    """Fused valid conv (stride 1) + bias + ReLU + 2x2/2 maxpool.

    p*_ref : (K, TM)   bf16  im2col patches for the 4 pool phases
    w_ref  : (Cout, K) bf16
    b_ref  : (Cout, 1) f32
    o_ref  : (Cout, TM) bf16   lane-dense (TM = tile of B*PH*PW)
    """
    w = w_ref[...]
    y0 = jnp.dot(w, p0_ref[...], preferred_element_type=jnp.float32)
    y1 = jnp.dot(w, p1_ref[...], preferred_element_type=jnp.float32)
    y2 = jnp.dot(w, p2_ref[...], preferred_element_type=jnp.float32)
    y3 = jnp.dot(w, p3_ref[...], preferred_element_type=jnp.float32)
    # max over the four phases == 2x2 maxpool; bias add / ReLU commute with max.
    y = jnp.maximum(jnp.maximum(y0, y1), jnp.maximum(y2, y3))
    y = jnp.maximum(y + b_ref[...], 0.0)
    o_ref[...] = y.astype(o_ref.dtype)


def _fc_stack_kernel(x_ref, w1_ref, b1_ref, w2_ref, b2_ref, w3_ref, b3_ref,
                     o_ref):
    """relu(x@w1+b1) -> relu(@w2+b2) -> @w3+b3; intermediates stay in VMEM."""
    h = jnp.dot(x_ref[...], w1_ref[...], preferred_element_type=jnp.float32)
    h = jnp.maximum(h + b1_ref[...], 0.0)
    h = jnp.dot(h.astype(w2_ref.dtype), w2_ref[...],
                preferred_element_type=jnp.float32)
    h = jnp.maximum(h + b2_ref[...], 0.0)
    y = jnp.dot(h.astype(w3_ref.dtype), w3_ref[...],
                preferred_element_type=jnp.float32)
    o_ref[...] = y + b3_ref[...]


# ----------------------------------------------------------------------------
# Wrappers
# ----------------------------------------------------------------------------
def conv_pool(x, w_mat, b, k):
    """x: (B,Cin,H,W) bf16 -> (B,Cout,PH,PW) bf16 (valid conv, ReLU, 2x2 pool)."""
    B, Cin, H, W = x.shape
    Cout, K = w_mat.shape
    OH, OW = H - k + 1, W - k + 1
    PH, PW = OH // 2, OW // 2
    M = B * PH * PW

    # One fused XLA patch-extraction op; feature ordering (cin, ki, kj)
    # matches w_mat = w.reshape(Cout, Cin*k*k).
    pat = jax.lax.conv_general_dilated_patches(
        x, filter_shape=(k, k), window_strides=(1, 1), padding="VALID",
        dimension_numbers=("NCHW", "OIHW", "NCHW"))          # (B, K, OH, OW)

    phases = []
    for di in (0, 1):
        for dj in (0, 1):
            ph = pat[:, :, di::2, dj::2]                      # (B, K, PH, PW)
            ph = jnp.transpose(ph, (1, 0, 2, 3)).reshape(K, M)
            phases.append(ph)

    # Tile the lane-dense M axis: batch-size robust VMEM usage, pipelined DMA,
    # and a "parallel" axis for v7x's two TensorCores.  (tm sized well under
    # v7x's 64 MiB VMEM with double-buffering of the 4 patch inputs.)
    tm = M if M <= 512 else 512
    nm = pl.cdiv(M, tm)

    out = pl.pallas_call(
        _conv_pool_kernel,
        out_shape=jax.ShapeDtypeStruct((Cout, M), jnp.bfloat16),
        grid=(nm,),
        in_specs=[pl.BlockSpec((K, tm), lambda i: (0, i)) for _ in range(4)]
        + [pl.BlockSpec((Cout, K), lambda i: (0, 0)),
           pl.BlockSpec((Cout, 1), lambda i: (0, 0))],
        out_specs=pl.BlockSpec((Cout, tm), lambda i: (0, i)),
        compiler_params=pltpu.CompilerParams(
            dimension_semantics=("parallel",)),
    )(*phases, w_mat, b)

    # (Cout, B*PH*PW) -> (B, Cout, PH, PW): only leading dims move (cheap).
    return jnp.transpose(out.reshape(Cout, B, PH, PW), (1, 0, 2, 3))


def fc_stack(x, params):
    """Fused fc1->relu->fc2->relu->fc3 in a single Pallas kernel."""
    B = x.shape[0]
    vmem = pl.BlockSpec(memory_space=pltpu.MemorySpace.VMEM)
    return pl.pallas_call(
        _fc_stack_kernel,
        out_shape=jax.ShapeDtypeStruct((B, 10), jnp.float32),
        in_specs=[vmem] * 7,
        out_specs=vmem,
    )(x, params["fc1_w"], params["fc1_b"], params["fc2_w"], params["fc2_b"],
      params["fc3_w"], params["fc3_b"])


# ----------------------------------------------------------------------------
# Parameter init (deterministic, PyTorch-like fan-in scaling).
# Weights stored pre-reshaped / pre-transposed for the kernels, bf16 for MXU.
# ----------------------------------------------------------------------------
def init_params(key):
    keys = jax.random.split(key, 10)

    def unif(k, shape, fan_in):
        bound = 1.0 / jnp.sqrt(fan_in)
        return jax.random.uniform(k, shape, jnp.float32, -bound, bound)

    return {
        # conv weights as (Cout, Cin*k*k) with (cin, ki, kj) feature ordering.
        "conv1_w": unif(keys[0], (6, 3 * 5 * 5), 3 * 5 * 5).astype(jnp.bfloat16),
        "conv1_b": unif(keys[1], (6, 1), 3 * 5 * 5),
        "conv2_w": unif(keys[2], (16, 6 * 5 * 5), 6 * 5 * 5).astype(jnp.bfloat16),
        "conv2_b": unif(keys[3], (16, 1), 6 * 5 * 5),
        # fc weights already transposed to (in, out).
        "fc1_w": unif(keys[4], (400, 120), 400).astype(jnp.bfloat16),
        "fc1_b": unif(keys[5], (1, 120), 400),
        "fc2_w": unif(keys[6], (120, 84), 120).astype(jnp.bfloat16),
        "fc2_b": unif(keys[7], (1, 84), 120),
        "fc3_w": unif(keys[8], (84, 10), 84).astype(jnp.bfloat16),
        "fc3_b": unif(keys[9], (1, 10), 84),
    }


# ----------------------------------------------------------------------------
# Full forward pass (mirrors Net.forward)
# ----------------------------------------------------------------------------
@jax.jit
def net_forward(params, x):
    # x: (B, 3, 32, 32) NCHW float32
    x = x.astype(jnp.bfloat16)                                  # MXU operands
    x = conv_pool(x, params["conv1_w"], params["conv1_b"], 5)   # (B, 6, 14, 14)
    x = conv_pool(x, params["conv2_w"], params["conv2_b"], 5)   # (B, 16, 5, 5)
    x = x.reshape(x.shape[0], 16 * 5 * 5)                       # (B, 400)
    return fc_stack(x, params)                                  # (B, 10) f32


# ----------------------------------------------------------------------------
# Pure-XLA reference with matching bf16-operand / f32-accumulate numerics.
# ----------------------------------------------------------------------------
def reference_forward(params, x):
    def conv_relu_pool(h, w_mat, b, cin, k):
        cout = w_mat.shape[0]
        w4 = w_mat.reshape(cout, cin, k, k)
        y = jax.lax.conv_general_dilated(
            h, w4, window_strides=(1, 1), padding="VALID",
            dimension_numbers=("NCHW", "OIHW", "NCHW"),
            preferred_element_type=jnp.float32)
        y = jnp.maximum(y + b.reshape(1, cout, 1, 1), 0.0)
        B, C, H, W = y.shape
        y = y.reshape(B, C, H // 2, 2, W // 2, 2).max(axis=(3, 5))
        return y.astype(jnp.bfloat16)

    h = x.astype(jnp.bfloat16)
    h = conv_relu_pool(h, params["conv1_w"], params["conv1_b"], 3, 5)
    h = conv_relu_pool(h, params["conv2_w"], params["conv2_b"], 6, 5)
    h = h.reshape(h.shape[0], 16 * 5 * 5)
    a = jnp.maximum(
        jnp.dot(h, params["fc1_w"], preferred_element_type=jnp.float32)
        + params["fc1_b"], 0.0)
    a = jnp.maximum(
        jnp.dot(a.astype(jnp.bfloat16), params["fc2_w"],
                preferred_element_type=jnp.float32) + params["fc2_b"], 0.0)
    return (jnp.dot(a.astype(jnp.bfloat16), params["fc3_w"],
                    preferred_element_type=jnp.float32) + params["fc3_b"])


if __name__ == "__main__":
    key = jax.random.PRNGKey(0)
    pkey, xkey = jax.random.split(key)
    params = init_params(pkey)
    # 32x32 RGB inputs implied by the 16*5*5 flatten after two conv+pool stages.
    x = jax.random.normal(xkey, (2, 3, 32, 32), dtype=jnp.float32)

    out = net_forward(params, x)
    jax.block_until_ready(out)
    assert out.shape == (2, 10), out.shape

    # Numerical check against a pure-XLA reference using the same mixed precision.
    ref = reference_forward(params, x)
    err = float(jnp.max(jnp.abs(out - ref)))
    assert err < 5e-2, f"max abs error vs reference: {err}"

    print("KERNEL_OK")
</pallas_src>

<mosaic_0001>
module attributes {stable_mosaic.version = 11 : i64} {
  func.func @_conv_pool_kernel(%arg0: i32, %arg1: memref<75x392xbf16, #tpu.memory_space<vmem>>, %arg2: memref<75x392xbf16, #tpu.memory_space<vmem>>, %arg3: memref<75x392xbf16, #tpu.memory_space<vmem>>, %arg4: memref<75x392xbf16, #tpu.memory_space<vmem>>, %arg5: memref<6x75xbf16, #tpu.memory_space<vmem>>, %arg6: memref<6x1xf32, #tpu.memory_space<vmem>>, %arg7: memref<6x392xbf16, #tpu.memory_space<vmem>>) attributes {dimension_semantics = [#tpu.dimension_semantics<parallel>], iteration_bounds = array<i64: 1>, scalar_prefetch = 0 : i64, scratch_operands = 0 : i64, tpu.core_type = #tpu.core_type<tc>, window_params = [{transform_indices = @transform_0, window_bounds = array<i64: 75, 392>}, {transform_indices = @transform_1, window_bounds = array<i64: 75, 392>}, {transform_indices = @transform_2, window_bounds = array<i64: 75, 392>}, {transform_indices = @transform_3, window_bounds = array<i64: 75, 392>}, {pipeline_mode = #tpu.pipeline_mode<synchronous>, transform_indices = @transform_4, window_bounds = array<i64: 6, 75>}, {pipeline_mode = #tpu.pipeline_mode<synchronous>, transform_indices = @transform_5, window_bounds = array<i64: 6, 1>}, {transform_indices = @transform_6, window_bounds = array<i64: 6, 392>}]} {
    %c0 = arith.constant 0 : index
    %c0_0 = arith.constant 0 : index
    %0 = vector.load %arg5[%c0, %c0_0] : memref<6x75xbf16, #tpu.memory_space<vmem>>, vector<6x75xbf16>
    %c0_1 = arith.constant 0 : index
    %c0_2 = arith.constant 0 : index
    %1 = vector.load %arg1[%c0_1, %c0_2] : memref<75x392xbf16, #tpu.memory_space<vmem>>, vector<75x392xbf16>
    %cst = arith.constant dense<0.000000e+00> : vector<6x392xf32>
    %2 = tpu.matmul %0, %1, %cst {dimension_numbers = #tpu.dot_dimension_numbers<[1], [0], [0], [1], [0, 0, 1, 1], [], []>} : vector<6x75xbf16>, vector<75x392xbf16>, vector<6x392xf32> -> vector<6x392xf32>
    %c0_3 = arith.constant 0 : index
    %c0_4 = arith.constant 0 : index
    %3 = vector.load %arg2[%c0_3, %c0_4] : memref<75x392xbf16, #tpu.memory_space<vmem>>, vector<75x392xbf16>
    %cst_5 = arith.constant dense<0.000000e+00> : vector<6x392xf32>
    %4 = tpu.matmul %0, %3, %cst_5 {dimension_numbers = #tpu.dot_dimension_numbers<[1], [0], [0], [1], [0, 0, 1, 1], [], []>} : vector<6x75xbf16>, vector<75x392xbf16>, vector<6x392xf32> -> vector<6x392xf32>
    %c0_6 = arith.constant 0 : index
    %c0_7 = arith.constant 0 : index
    %5 = vector.load %arg3[%c0_6, %c0_7] : memref<75x392xbf16, #tpu.memory_space<vmem>>, vector<75x392xbf16>
    %cst_8 = arith.constant dense<0.000000e+00> : vector<6x392xf32>
    %6 = tpu.matmul %0, %5, %cst_8 {dimension_numbers = #tpu.dot_dimension_numbers<[1], [0], [0], [1], [0, 0, 1, 1], [], []>} : vector<6x75xbf16>, vector<75x392xbf16>, vector<6x392xf32> -> vector<6x392xf32>
    %c0_9 = arith.constant 0 : index
    %c0_10 = arith.constant 0 : index
    %7 = vector.load %arg4[%c0_9, %c0_10] : memref<75x392xbf16, #tpu.memory_space<vmem>>, vector<75x392xbf16>
    %cst_11 = arith.constant dense<0.000000e+00> : vector<6x392xf32>
    %8 = tpu.matmul %0, %7, %cst_11 {dimension_numbers = #tpu.dot_dimension_numbers<[1], [0], [0], [1], [0, 0, 1, 1], [], []>} : vector<6x75xbf16>, vector<75x392xbf16>, vector<6x392xf32> -> vector<6x392xf32>
    %9 = arith.maximumf %2, %4 : vector<6x392xf32>
    %10 = arith.maximumf %6, %8 : vector<6x392xf32>
    %11 = arith.maximumf %9, %10 : vector<6x392xf32>
    %c0_12 = arith.constant 0 : index
    %c0_13 = arith.constant 0 : index
    %12 = vector.load %arg6[%c0_12, %c0_13] : memref<6x1xf32, #tpu.memory_space<vmem>>, vector<6x1xf32>
    %13 = vector.broadcast %12 : vector<6x1xf32> to vector<6x392xf32>
    %14 = arith.addf %11, %13 : vector<6x392xf32>
    %cst_14 = arith.constant 0.000000e+00 : f32
    %15 = vector.broadcast %cst_14 : f32 to vector<6x392xf32>
    %16 = arith.maximumf %14, %15 : vector<6x392xf32>
    %17 = arith.truncf %16 : vector<6x392xf32> to vector<6x392xbf16>
    %c0_15 = arith.constant 0 : index
    %c0_16 = arith.constant 0 : index
    %18 = vector.load %arg7[%c0_15, %c0_16] : memref<6x392xbf16, #tpu.memory_space<vmem>>, vector<6x392xbf16>
    tpu.vector_store %arg7[%c0_15, %c0_16], %17 {strides = array<i32>} : memref<6x392xbf16, #tpu.memory_space<vmem>>, vector<6x392xbf16>,
    return
  }
  func.func @transform_0(%arg0: i32) -> (i32, i32) {
    %c0_i32 = arith.constant 0 : i32
    %c0_i32_0 = arith.constant 0 : i32
    return %c0_i32, %arg0 : i32, i32
  }
  func.func @transform_1(%arg0: i32) -> (i32, i32) {
    %c0_i32 = arith.constant 0 : i32
    %c0_i32_0 = arith.constant 0 : i32
    return %c0_i32, %arg0 : i32, i32
  }
  func.func @transform_2(%arg0: i32) -> (i32, i32) {
    %c0_i32 = arith.constant 0 : i32
    %c0_i32_0 = arith.constant 0 : i32
    return %c0_i32, %arg0 : i32, i32
  }
  func.func @transform_3(%arg0: i32) -> (i32, i32) {
    %c0_i32 = arith.constant 0 : i32
    %c0_i32_0 = arith.constant 0 : i32
    return %c0_i32, %arg0 : i32, i32
  }
  func.func @transform_4(%arg0: i32) -> (i32, i32) {
    %c0_i32 = arith.constant 0 : i32
    %c0_i32_0 = arith.constant 0 : i32
    %c0_i32_1 = arith.constant 0 : i32
    return %c0_i32, %c0_i32_0 : i32, i32
  }
  func.func @transform_5(%arg0: i32) -> (i32, i32) {
    %c0_i32 = arith.constant 0 : i32
    %c0_i32_0 = arith.constant 0 : i32
    %c0_i32_1 = arith.constant 0 : i32
    return %c0_i32, %c0_i32_0 : i32, i32
  }
  func.func @transform_6(%arg0: i32) -> (i32, i32) {
    %c0_i32 = arith.constant 0 : i32
    %c0_i32_0 = arith.constant 0 : i32
    return %c0_i32, %arg0 : i32, i32
  }
}

module attributes {stable_mosaic.version = 11 : i64} {
  func.func @_conv_pool_kernel(%arg0: i32, %arg1: memref<150x50xbf16, #tpu.memory_space<vmem>>, %arg2: memref<150x50xbf16, #tpu.memory_space<vmem>>, %arg3: memref<150x50xbf16, #tpu.memory_space<vmem>>, %arg4: memref<150x50xbf16, #tpu.memory_space<vmem>>, %arg5: memref<16x150xbf16, #tpu.memory_space<vmem>>, %arg6: memref<16x1xf32, #tpu.memory_space<vmem>>, %arg7: memref<16x50xbf16, #tpu.memory_space<vmem>>) attributes {dimension_semantics = [#tpu.dimension_semantics<parallel>], iteration_bounds = array<i64: 1>, scalar_prefetch = 0 : i64, scratch_operands = 0 : i64, tpu.core_type = #tpu.core_type<tc>, window_params = [{transform_indices = @transform_0, window_bounds = array<i64: 150, 50>}, {transform_indices = @transform_1, window_bounds = array<i64: 150, 50>}, {transform_indices = @transform_2, window_bounds = array<i64: 150, 50>}, {transform_indices = @transform_3, window_bounds = array<i64: 150, 50>}, {pipeline_mode = #tpu.pipeline_mode<synchronous>, transform_indices = @transform_4, window_bounds = array<i64: 16, 150>}, {pipeline_mode = #tpu.pipeline_mode<synchronous>, transform_indices = @transform_5, window_bounds = array<i64: 16, 1>}, {transform_indices = @transform_6, window_bounds = array<i64: 16, 50>}]} {
    %c0 = arith.constant 0 : index
    %c0_0 = arith.constant 0 : index
    %0 = vector.load %arg5[%c0, %c0_0] : memref<16x150xbf16, #tpu.memory_space<vmem>>, vector<16x150xbf16>
    %c0_1 = arith.constant 0 : index
    %c0_2 = arith.constant 0 : index
    %1 = vector.load %arg1[%c0_1, %c0_2] : memref<150x50xbf16, #tpu.memory_space<vmem>>, vector<150x50xbf16>
    %cst = arith.constant dense<0.000000e+00> : vector<16x50xf32>
    %2 = tpu.matmul %0, %1, %cst {dimension_numbers = #tpu.dot_dimension_numbers<[1], [0], [0], [1], [0, 0, 1, 1], [], []>} : vector<16x150xbf16>, vector<150x50xbf16>, vector<16x50xf32> -> vector<16x50xf32>
    %c0_3 = arith.constant 0 : index
    %c0_4 = arith.constant 0 : index
    %3 = vector.load %arg2[%c0_3, %c0_4] : memref<150x50xbf16, #tpu.memory_space<vmem>>, vector<150x50xbf16>
    %cst_5 = arith.constant dense<0.000000e+00> : vector<16x50xf32>
    %4 = tpu.matmul %0, %3, %cst_5 {dimension_numbers = #tpu.dot_dimension_numbers<[1], [0], [0], [1], [0, 0, 1, 1], [], []>} : vector<16x150xbf16>, vector<150x50xbf16>, vector<16x50xf32> -> vector<16x50xf32>
    %c0_6 = arith.constant 0 : index
    %c0_7 = arith.constant 0 : index
    %5 = vector.load %arg3[%c0_6, %c0_7] : memref<150x50xbf16, #tpu.memory_space<vmem>>, vector<150x50xbf16>
    %cst_8 = arith.constant dense<0.000000e+00> : vector<16x50xf32>
    %6 = tpu.matmul %0, %5, %cst_8 {dimension_numbers = #tpu.dot_dimension_numbers<[1], [0], [0], [1], [0, 0, 1, 1], [], []>} : vector<16x150xbf16>, vector<150x50xbf16>, vector<16x50xf32> -> vector<16x50xf32>
    %c0_9 = arith.constant 0 : index
    %c0_10 = arith.constant 0 : index
    %7 = vector.load %arg4[%c0_9, %c0_10] : memref<150x50xbf16, #tpu.memory_space<vmem>>, vector<150x50xbf16>
    %cst_11 = arith.constant dense<0.000000e+00> : vector<16x50xf32>
    %8 = tpu.matmul %0, %7, %cst_11 {dimension_numbers = #tpu.dot_dimension_numbers<[1], [0], [0], [1], [0, 0, 1, 1], [], []>} : vector<16x150xbf16>, vector<150x50xbf16>, vector<16x50xf32> -> vector<16x50xf32>
    %9 = arith.maximumf %2, %4 : vector<16x50xf32>
    %10 = arith.maximumf %6, %8 : vector<16x50xf32>
    %11 = arith.maximumf %9, %10 : vector<16x50xf32>
    %c0_12 = arith.constant 0 : index
    %c0_13 = arith.constant 0 : index
    %12 = vector.load %arg6[%c0_12, %c0_13] : memref<16x1xf32, #tpu.memory_space<vmem>>, vector<16x1xf32>
    %13 = vector.broadcast %12 : vector<16x1xf32> to vector<16x50xf32>
    %14 = arith.addf %11, %13 : vector<16x50xf32>
    %cst_14 = arith.constant 0.000000e+00 : f32
    %15 = vector.broadcast %cst_14 : f32 to vector<16x50xf32>
    %16 = arith.maximumf %14, %15 : vector<16x50xf32>
    %17 = arith.truncf %16 : vector<16x50xf32> to vector<16x50xbf16>
    %c0_15 = arith.constant 0 : index
    %c0_16 = arith.constant 0 : index
    %18 = vector.load %arg7[%c0_15, %c0_16] : memref<16x50xbf16, #tpu.memory_space<vmem>>, vector<16x50xbf16>
    tpu.vector_store %arg7[%c0_15, %c0_16], %17 {strides = array<i32>} : memref<16x50xbf16, #tpu.memory_space<vmem>>, vector<16x50xbf16>,
    return
  }
  func.func @transform_0(%arg0: i32) -> (i32, i32) {
    %c0_i32 = arith.constant 0 : i32
    %c0_i32_0 = arith.constant 0 : i32
    return %c0_i32, %arg0 : i32, i32
  }
  func.func @transform_1(%arg0: i32) -> (i32, i32) {
    %c0_i32 = arith.constant 0 : i32
    %c0_i32_0 = arith.constant 0 : i32
    return %c0_i32, %arg0 : i32, i32
  }
  func.func @transform_2(%arg0: i32) -> (i32, i32) {
    %c0_i32 = arith.constant 0 : i32
    %c0_i32_0 = arith.constant 0 : i32
    return %c0_i32, %arg0 : i32, i32
  }
  func.func @transform_3(%arg0: i32) -> (i32, i32) {
    %c0_i32 = arith.constant 0 : i32
    %c0_i32_0 = arith.constant 0 : i32
    return %c0_i32, %arg0 : i32, i32
  }
  func.func @transform_4(%arg0: i32) -> (i32, i32) {
    %c0_i32 = arith.constant 0 : i32
    %c0_i32_0 = arith.constant 0 : i32
    %c0_i32_1 = arith.constant 0 : i32
    return %c0_i32, %c0_i32_0 : i32, i32
  }
  func.func @transform_5(%arg0: i32) -> (i32, i32) {
    %c0_i32 = arith.constant 0 : i32
    %c0_i32_0 = arith.constant 0 : i32
    %c0_i32_1 = arith.constant 0 : i32
    return %c0_i32, %c0_i32_0 : i32, i32
  }
  func.func @transform_6(%arg0: i32) -> (i32, i32) {
    %c0_i32 = arith.constant 0 : i32
    %c0_i32_0 = arith.constant 0 : i32
    return %c0_i32, %arg0 : i32, i32
  }
}

module attributes {stable_mosaic.version = 11 : i64} {
  func.func @_fc_stack_kernel(%arg0: memref<2x400xbf16, #tpu.memory_space<vmem>>, %arg1: memref<400x120xbf16, #tpu.memory_space<vmem>>, %arg2: memref<1x120xf32, #tpu.memory_space<vmem>>, %arg3: memref<120x84xbf16, #tpu.memory_space<vmem>>, %arg4: memref<1x84xf32, #tpu.memory_space<vmem>>, %arg5: memref<84x10xbf16, #tpu.memory_space<vmem>>, %arg6: memref<1x10xf32, #tpu.memory_space<vmem>>, %arg7: memref<2x10xf32, #tpu.memory_space<vmem>>) attributes {dimension_semantics = [], scalar_prefetch = 0 : i64, scratch_operands = 0 : i64, tpu.core_type = #tpu.core_type<tc>} {
    %c0 = arith.constant 0 : index
    %c0_0 = arith.constant 0 : index
    %0 = vector.load %arg0[%c0, %c0_0] : memref<2x400xbf16, #tpu.memory_space<vmem>>, vector<2x400xbf16>
    %c0_1 = arith.constant 0 : index
    %c0_2 = arith.constant 0 : index
    %1 = vector.load %arg1[%c0_1, %c0_2] : memref<400x120xbf16, #tpu.memory_space<vmem>>, vector<400x120xbf16>
    %cst = arith.constant dense<0.000000e+00> : vector<2x120xf32>
    %2 = tpu.matmul %0, %1, %cst {dimension_numbers = #tpu.dot_dimension_numbers<[1], [0], [0], [1], [0, 0, 1, 1], [], []>} : vector<2x400xbf16>, vector<400x120xbf16>, vector<2x120xf32> -> vector<2x120xf32>
    %c0_3 = arith.constant 0 : index
    %c0_4 = arith.constant 0 : index
    %3 = vector.load %arg2[%c0_3, %c0_4] : memref<1x120xf32, #tpu.memory_space<vmem>>, vector<1x120xf32>
    %4 = vector.broadcast %3 : vector<1x120xf32> to vector<2x120xf32>
    %5 = arith.addf %2, %4 : vector<2x120xf32>
    %cst_5 = arith.constant 0.000000e+00 : f32
    %6 = vector.broadcast %cst_5 : f32 to vector<2x120xf32>
    %7 = arith.maximumf %5, %6 : vector<2x120xf32>
    %8 = arith.truncf %7 : vector<2x120xf32> to vector<2x120xbf16>
    %c0_6 = arith.constant 0 : index
    %c0_7 = arith.constant 0 : index
    %9 = vector.load %arg3[%c0_6, %c0_7] : memref<120x84xbf16, #tpu.memory_space<vmem>>, vector<120x84xbf16>
    %cst_8 = arith.constant dense<0.000000e+00> : vector<2x84xf32>
    %10 = tpu.matmul %8, %9, %cst_8 {dimension_numbers = #tpu.dot_dimension_numbers<[1], [0], [0], [1], [0, 0, 1, 1], [], []>} : vector<2x120xbf16>, vector<120x84xbf16>, vector<2x84xf32> -> vector<2x84xf32>
    %c0_9 = arith.constant 0 : index
    %c0_10 = arith.constant 0 : index
    %11 = vector.load %arg4[%c0_9, %c0_10] : memref<1x84xf32, #tpu.memory_space<vmem>>, vector<1x84xf32>
    %12 = vector.broadcast %11 : vector<1x84xf32> to vector<2x84xf32>
    %13 = arith.addf %10, %12 : vector<2x84xf32>
    %cst_11 = arith.constant 0.000000e+00 : f32
    %14 = vector.broadcast %cst_11 : f32 to vector<2x84xf32>
    %15 = arith.maximumf %13, %14 : vector<2x84xf32>
    %16 = arith.truncf %15 : vector<2x84xf32> to vector<2x84xbf16>
    %c0_12 = arith.constant 0 : index
    %c0_13 = arith.constant 0 : index
    %17 = vector.load %arg5[%c0_12, %c0_13] : memref<84x10xbf16, #tpu.memory_space<vmem>>, vector<84x10xbf16>
    %cst_14 = arith.constant dense<0.000000e+00> : vector<2x10xf32>
    %18 = tpu.matmul %16, %17, %cst_14 {dimension_numbers = #tpu.dot_dimension_numbers<[1], [0], [0], [1], [0, 0, 1, 1], [], []>} : vector<2x84xbf16>, vector<84x10xbf16>, vector<2x10xf32> -> vector<2x10xf32>
    %c0_15 = arith.constant 0 : index
    %c0_16 = arith.constant 0 : index
    %19 = vector.load %arg6[%c0_15, %c0_16] : memref<1x10xf32, #tpu.memory_space<vmem>>, vector<1x10xf32>
    %20 = vector.broadcast %19 : vector<1x10xf32> to vector<2x10xf32>
    %21 = arith.addf %18, %20 : vector<2x10xf32>
    %c0_17 = arith.constant 0 : index
    %c0_18 = arith.constant 0 : index
    %22 = vector.load %arg7[%c0_17, %c0_18] : memref<2x10xf32, #tpu.memory_space<vmem>>, vector<2x10xf32>
    tpu.vector_store %arg7[%c0_17, %c0_18], %21 {strides = array<i32>} : memref<2x10xf32, #tpu.memory_space<vmem>>, vector<2x10xf32>,
    return
  }
}

</mosaic_0001>

<bundles_post_ra>
// kernel: net_forward.3
= control target key start
LH: loop header
LB: loop body
LE: loop exit
PB: predicated region body
PF: predicated region fallthrough
CT: control target
= control target key end

     0   :  { %vm145_vm0 = vcmask 1044480   ;;  %vm146_vm1 = vcmask 1045504   ;;  %v1209_v2 = vmov 65535   ;;  %vm141_vm2 = vcmask 613376   ;;  %s1790_s0 = inlined_call_operand.vmem [shape: bf16[75,392], index: 0, kind: input, shape index: {}]   ;;  %s1791_s1 = inlined_call_operand.vmem [shape: bf16[75,392], index: 1, kind: input, shape index: {}]   ;;  %s1792_s4 = inlined_call_operand.vmem [shape: bf16[6,75], index: 4, kind: input, shape index: {}]   ;;  %s1793_s2 = inlined_call_operand.vmem [shape: bf16[75,392], index: 2, kind: input, shape index: {}]   ;;  %s1794_s3 = inlined_call_operand.vmem [shape: bf16[75,392], index: 3, kind: input, shape index: {}]   ;;  %s1795_s5 = inlined_call_operand.vmem [shape: f32[6,1], index: 5, kind: input, shape index: {}]   ;;  %s1796_s6 = inlined_call_operand.vmem [shape: bf16[6,392], index: 6, kind: output, shape index: {}]  }
   0x1   :  { %v856_v0 = vld [vmem:[%s1790_s0 + $0x80] sm:$0xf]  ;;  %v1144_v1 = vld [vmem:[%s1790_s0 + $0x8c] sm:$0x30]  ;;  %v147_v3 = vsel %vm145_vm0, 4294967295, %v1209_v2  ;;  %vm782_vm3 = vcmask 1042432  }
   0x2   :  { %v857_v4 = vor.u32 %v1144_v1, %v856_v0  ;;  %v1252_v5 = vsel %vm146_vm1, %v147_v3, 0  ;;  %v1142_v6 = vld [vmem:[%s1790_s0 + $0x84] sm:$0xf]  ;;  %v858_v7 = vld [vmem:[%s1790_s0 + $0x90] sm:$0x30]  ;;  %vm783_vm4 = vcmask 63492  }
   0x3   :  { %v861_v8 = vor.u32 %v1142_v6, %v858_v7  ;;  %v864_v9 = vld [vmem:[%s1790_s0 + $0x88] sm:$0xf]  ;;  %v1145_v10 = vld [vmem:[%s1790_s0 + $0x94] sm:$0x30]  ;;  %v1143_v11 = vld [vmem:[%s1790_s0 + $0x8c] sm:$0xf] }
   0x4   :  { %v150_v12 = vand.u32 %v857_v4, %v1252_v5  ;;  %v865_v13 = vor.u32 %v1145_v10, %v864_v9  ;;  %v866_v14 = vld [vmem:[%s1790_s0 + $0x98] sm:$0x30]  ;;  %v840_v15 = vld [vmem:[%s1790_s0 + $0x60] sm:$0xf]  ;;  %v1140_v16 = vld [vmem:[%s1790_s0 + $0x6c] sm:$0xf0] }
   0x5   :  { %v153_v17 = vand.u32 %v861_v8, %v1252_v5  ;;  %v869_v18 = vor.u32 %v1143_v11, %v866_v14  ;;  %v1138_v19 = vld [vmem:[%s1790_s0 + $0x64] sm:$0xf]  ;;  %v842_v20 = vld [vmem:[%s1790_s0 + $0x70] sm:$0xf0]  ;;  %v848_v21 = vld [vmem:[%s1790_s0 + $0x68] sm:$0xf]  ;;  %v841_v23 = vor.u32 %v1140_v16, %v840_v15 }
   0x6   :  { %164 = vmatpush.bf16.msra.mxu0 %v150_v12  ;;  %v156_v22 = vand.u32 %v865_v13, %v1252_v5  ;;  %v1141_v24 = vld [vmem:[%s1790_s0 + $0x74] sm:$0xf0]  ;;  %v1139_v25 = vld [vmem:[%s1790_s0 + $0x6c] sm:$0xf]  ;;  %v850_v26 = vld [vmem:[%s1790_s0 + $0x78] sm:$0xf0]  ;;  %v845_v28 = vor.u32 %v1138_v19, %v842_v20 }
   0x7   :  { %177 = vmatpush.bf16.msra.mxu1 %v153_v17  ;;  %v159_v27 = vand.u32 %v869_v18, %v1252_v5  ;;  %v824_v29 = vld [vmem:[%s1790_s0 + $0x40] sm:$0xf]  ;;  %v1136_v30 = vld [vmem:[%s1790_s0 + $0x4c] sm:$0xf0]  ;;  %v849_v31 = vor.u32 %v1141_v24, %v848_v21  ;;  %v1134_v32 = vld [vmem:[%s1790_s0 + $0x44] sm:$0xf]  ;;  %v853_v34 = vor.u32 %v1139_v25, %v850_v26 }
   0x8   :  { %190 = vmatpush.bf16.msra.mxu2 %v156_v22  ;;  %v826_v33 = vld [vmem:[%s1790_s0 + $0x50] sm:$0xf0]  ;;  %v832_v35 = vld [vmem:[%s1790_s0 + $0x48] sm:$0xf]  ;;  %v1137_v36 = vld [vmem:[%s1790_s0 + $0x54] sm:$0xf0]  ;;  %v825_v37 = vor.u32 %v1136_v30, %v824_v29 }
   0x9   :  { %203 = vmatpush.bf16.msra.mxu3 %v159_v27  ;;  %v1135_v38 = vld [vmem:[%s1790_s0 + $0x4c] sm:$0xf]  ;;  %v834_v39 = vld [vmem:[%s1790_s0 + $0x58] sm:$0xf0]  ;;  %v829_v40 = vor.u32 %v1134_v32, %v826_v33  ;;  %v808_v41 = vld [vmem:[%s1790_s0 + $0x20] sm:$0xf]  ;;  %v833_v44 = vor.u32 %v1137_v36, %v832_v35 }
   0xa   :  { %165 = vmatpush.bf16.msra.mxu0 %v841_v23  ;;  %v1132_v42 = vld [vmem:[%s1790_s0 + $0x2c] sm:$0xf0]  ;;  %v1130_v43 = vld [vmem:[%s1790_s0 + $0x24] sm:$0xf]  ;;  %v810_v45 = vld [vmem:[%s1790_s0 + $0x30] sm:$0xf0]  ;;  %v837_v48 = vor.u32 %v1135_v38, %v834_v39 }
   0xb   :  { %178 = vmatpush.bf16.msra.mxu1 %v845_v28  ;;  %v816_v46 = vld [vmem:[%s1790_s0 + $0x28] sm:$0xf]  ;;  %v1133_v47 = vld [vmem:[%s1790_s0 + $0x34] sm:$0xf0]  ;;  %v1131_v49 = vld [vmem:[%s1790_s0 + $0x2c] sm:$0xf]  ;;  %v809_v52 = vor.u32 %v1132_v42, %v808_v41  ;;  %v813_v56 = vor.u32 %v1130_v43, %v810_v45 }
   0xc   :  { %191 = vmatpush.bf16.msra.mxu2 %v849_v31  ;;  %v818_v50 = vld [vmem:[%s1790_s0 + $0x38] sm:$0xf0]  ;;  %v792_v51 = vld [vmem:[%s1790_s0] sm:$0xf]  ;;  %v1128_v53 = vld [vmem:[%s1790_s0 + $0xc] sm:$0xf0]  ;;  %v817_v61 = vor.u32 %v1133_v47, %v816_v46 }
   0xd   :  { %204 = vmatpush.bf16.msra.mxu3 %v853_v34  ;;  %v1126_v54 = vld [vmem:[%s1790_s0 + $0x4] sm:$0xf]  ;;  %v794_v55 = vld [vmem:[%s1790_s0 + $0x10] sm:$0xf0]  ;;  %v800_v57 = vld [vmem:[%s1790_s0 + $0x8] sm:$0xf]  ;;  %v821_v2 = vor.u32 %v1131_v49, %v818_v50  ;;  %v793_v9 = vor.u32 %v1128_v53, %v792_v51 }
   0xe   :  { %166 = vmatpush.bf16.msra.mxu0 %v825_v37  ;;  %v940_v58 = vld [vmem:[%s1791_s1 + $0x80] sm:$0xf]  ;;  %v1164_v59 = vld [vmem:[%s1791_s1 + $0x8c] sm:$0x30]  ;;  %v1162_v60 = vld [vmem:[%s1791_s1 + $0x84] sm:$0xf]  ;;  %v797_v13 = vor.u32 %v1126_v54, %v794_v55 }
   0xf   :  { %179 = vmatpush.bf16.msra.mxu1 %v829_v40  ;;  %v941_v62 = vor.u32 %v1164_v59, %v940_v58  ;;  %v942_v63 = vld [vmem:[%s1791_s1 + $0x90] sm:$0x30]  ;;  %v948_v0 = vld [vmem:[%s1791_s1 + $0x88] sm:$0xf]  ;;  %v1165_v1 = vld [vmem:[%s1791_s1 + $0x94] sm:$0x30] }
  0x10   :  { %192 = vmatpush.bf16.msra.mxu2 %v833_v44  ;;  %v1129_v3 = vld [vmem:[%s1790_s0 + $0x14] sm:$0xf0]  ;;  %v945_v4 = vor.u32 %v1162_v60, %v942_v63  ;;  %v949_v6 = vor.u32 %v1165_v1, %v948_v0  ;;  %v1163_v7 = vld [vmem:[%s1791_s1 + $0x8c] sm:$0xf]  ;;  %v950_v8 = vld [vmem:[%s1791_s1 + $0x98] sm:$0x30] }
  0x11   :  { %205 = vmatpush.bf16.msra.mxu3 %v837_v48  ;;  %v1127_v10 = vld [vmem:[%s1790_s0 + $0xc] sm:$0xf]  ;;  %v802_v11 = vld [vmem:[%s1790_s0 + $0x18] sm:$0xf0]  ;;  %v953_v12 = vor.u32 %v1163_v7, %v950_v8  ;;  %v330_v14 = vand.u32 %v941_v62, %v1252_v5  ;;  %v801_v15 = vor.u32 %v1129_v3, %v800_v57  ;;  %v924_v19 = vld [vmem:[%s1791_s1 + $0x60] sm:$0xf] }
  0x12   :  { %167 = vmatpush.bf16.msra.mxu0 %v809_v52  ;;  %v333_v16 = vand.u32 %v945_v4, %v1252_v5  ;;  %v805_v17 = vor.u32 %v1127_v10, %v802_v11  ;;  %v336_v18 = vand.u32 %v949_v6, %v1252_v5  ;;  %v1160_v20 = vld [vmem:[%s1791_s1 + $0x6c] sm:$0xf0]  ;;  %v1158_v21 = vld [vmem:[%s1791_s1 + $0x64] sm:$0xf]  ;;  %v926_v23 = vld [vmem:[%s1791_s1 + $0x70] sm:$0xf0] }
  0x13   :  { %180 = vmatpush.bf16.msra.mxu1 %v813_v56  ;;  %v339_v22 = vand.u32 %v953_v12, %v1252_v5  ;;  %v932_v24 = vld [vmem:[%s1791_s1 + $0x68] sm:$0xf]  ;;  %v1161_v25 = vld [vmem:[%s1791_s1 + $0x74] sm:$0xf0]  ;;  %v1421_v26 = vld [vmem:[%s1792_s4] sm:$0x7]  ;;  %v925_v29 = vor.u32 %v1160_v20, %v924_v19  ;;  %v929_v30 = vor.u32 %v1158_v21, %v926_v23 }
  0x14   :  { %193 = vmatpush.bf16.msra.mxu2 %v817_v61  ;;  %v1159_v27 = vld [vmem:[%s1791_s1 + $0x6c] sm:$0xf]  ;;  %v934_v28 = vld [vmem:[%s1791_s1 + $0x78] sm:$0xf0]  ;;  %v933_v31 = vor.u32 %v1161_v25, %v932_v24  ;;  %v908_v32 = vld [vmem:[%s1791_s1 + $0x40] sm:$0xf] }
  0x15   :  { %206 = vmatpush.bf16.msra.mxu3 %v821_v2  ;;  %v1156_v33 = vld [vmem:[%s1791_s1 + $0x4c] sm:$0xf0]  ;;  %v1154_v34 = vld [vmem:[%s1791_s1 + $0x44] sm:$0xf]  ;;  %v937_v35 = vor.u32 %v1159_v27, %v934_v28  ;;  %v910_v36 = vld [vmem:[%s1791_s1 + $0x50] sm:$0xf0] }
  0x16   :  { %168 = vmatpush.bf16.msra.mxu0 %v793_v9  ;;  %v916_v37 = vld [vmem:[%s1791_s1 + $0x48] sm:$0xf]  ;;  %v1157_v38 = vld [vmem:[%s1791_s1 + $0x54] sm:$0xf0]  ;;  %v1155_v39 = vld [vmem:[%s1791_s1 + $0x4c] sm:$0xf]  ;;  %v909_v41 = vor.u32 %v1156_v33, %v908_v32  ;;  %v913_v44 = vor.u32 %v1154_v34, %v910_v36 }
  0x17   :  { %181 = vmatpush.bf16.msra.mxu1 %v797_v13  ;;  %v918_v40 = vld [vmem:[%s1791_s1 + $0x58] sm:$0xf0]  ;;  %v892_v42 = vld [vmem:[%s1791_s1 + $0x20] sm:$0xf]  ;;  %v1152_v43 = vld [vmem:[%s1791_s1 + $0x2c] sm:$0xf0]  ;;  %v917_v45 = vor.u32 %v1157_v38, %v916_v37 }
  0x18   :  { %194 = vmatpush.bf16.msra.mxu2 %v801_v15  ;;  %v1150_v46 = vld [vmem:[%s1791_s1 + $0x24] sm:$0xf]  ;;  %v894_v47 = vld [vmem:[%s1791_s1 + $0x30] sm:$0xf0]  ;;  %v900_v48 = vld [vmem:[%s1791_s1 + $0x28] sm:$0xf]  ;;  %v921_v49 = vor.u32 %v1155_v39, %v918_v40  ;;  %v893_v58 = vor.u32 %v1152_v43, %v892_v42 }
  0x19   :  { %207 = vmatpush.bf16.msra.mxu3 %v805_v17  ;;  %870 = vmatmul.msk.bf16.vlgmr.msra.gmra.mxu0 %vm141_vm2, %v1421_v26  ;;  %v1153_v50 = vld [vmem:[%s1791_s1 + $0x34] sm:$0xf0]  ;;  %v1151_v51 = vld [vmem:[%s1791_s1 + $0x2c] sm:$0xf]  ;;  %v902_v52 = vld [vmem:[%s1791_s1 + $0x38] sm:$0xf0]  ;;  %v897_v62 = vor.u32 %v1150_v46, %v894_v47 }
  0x1a   :  { %344 = vmatpush.bf16.msrb.mxu0 %v330_v14  ;;  %871 = vmatmul.msk.bf16.vlgmr.msra.gmra.mxu1 %vm141_vm2, %v1421_v26  ;;  %v876_v53 = vld [vmem:[%s1791_s1] sm:$0xf]  ;;  %v1148_v54 = vld [vmem:[%s1791_s1 + $0xc] sm:$0xf0]  ;;  %v1182_v57 = vld [vmem:[%s1793_s2 + $0x84] sm:$0xf]  ;;  %v901_v63 = vor.u32 %v1153_v50, %v900_v48  ;;  %v905_v3 = vor.u32 %v1151_v51, %v902_v52 }
  0x1b   :  { %357 = vmatpush.bf16.msrb.mxu1 %v333_v16  ;;  %872 = vmatmul.msk.bf16.vlgmr.msra.gmra.mxu2 %vm141_vm2, %v1421_v26  ;;  %v1024_v55 = vld [vmem:[%s1793_s2 + $0x80] sm:$0xf]  ;;  %v1184_v56 = vld [vmem:[%s1793_s2 + $0x8c] sm:$0x30]  ;;  %v1026_v59 = vld [vmem:[%s1793_s2 + $0x90] sm:$0x30]  ;;  %v877_v13 = vor.u32 %v1148_v54, %v876_v53 }
  0x1c   :  { %370 = vmatpush.bf16.msrb.mxu2 %v336_v18  ;;  %873 = vmatmul.msk.bf16.vlgmr.msra.gmra.mxu3 %vm141_vm2, %v1421_v26  ;;  %v1032_v60 = vld [vmem:[%s1793_s2 + $0x88] sm:$0xf]  ;;  %v1185_v61 = vld [vmem:[%s1793_s2 + $0x94] sm:$0x30]  ;;  %v1146_v0 = vld [vmem:[%s1791_s1 + $0x4] sm:$0xf]  ;;  %v1025_v8 = vor.u32 %v1184_v56, %v1024_v55  ;;  %v1029_v11 = vor.u32 %v1182_v57, %v1026_v59 }
  0x1d   :  { %383 = vmatpush.bf16.msrb.mxu3 %v339_v22  ;;  %v1183_v1 = vld [vmem:[%s1793_s2 + $0x8c] sm:$0xf]  ;;  %v1034_v2 = vld [vmem:[%s1793_s2 + $0x98] sm:$0x30]  ;;  %v878_v4 = vld [vmem:[%s1791_s1 + $0x10] sm:$0xf0]  ;;  %v1033_v12 = vor.u32 %v1185_v61, %v1032_v60 }
  0x1e   :  { %345 = vmatpush.bf16.msrb.mxu0 %v925_v29  ;;  %v884_v6 = vld [vmem:[%s1791_s1 + $0x8] sm:$0xf]  ;;  %v1149_v7 = vld [vmem:[%s1791_s1 + $0x14] sm:$0xf0]  ;;  %v1147_v9 = vld [vmem:[%s1791_s1 + $0xc] sm:$0xf]  ;;  %v1037_v14 = vor.u32 %v1183_v1, %v1034_v2  ;;  %v881_v15 = vor.u32 %v1146_v0, %v878_v4  ;;  %v510_v18 = vand.u32 %v1025_v8, %v1252_v5  ;;  %v513_v19 = vand.u32 %v1029_v11, %v1252_v5 }
  0x1f   :  { %358 = vmatpush.bf16.msrb.mxu1 %v929_v30  ;;  %v886_v10 = vld [vmem:[%s1791_s1 + $0x18] sm:$0xf0]  ;;  %v885_v16 = vor.u32 %v1149_v7, %v884_v6  ;;  %v516_v20 = vand.u32 %v1033_v12, %v1252_v5  ;;  %v1008_v21 = vld [vmem:[%s1793_s2 + $0x60] sm:$0xf]  ;;  %v1180_v22 = vld [vmem:[%s1793_s2 + $0x6c] sm:$0xf0] }
  0x20   :  { %371 = vmatpush.bf16.msrb.mxu2 %v933_v31  ;;  %v889_v17 = vor.u32 %v1147_v9, %v886_v10  ;;  %v1178_v23 = vld [vmem:[%s1793_s2 + $0x64] sm:$0xf]  ;;  %v519_v24 = vand.u32 %v1037_v14, %v1252_v5  ;;  %v1010_v25 = vld [vmem:[%s1793_s2 + $0x70] sm:$0xf0]  ;;  %v1016_v27 = vld [vmem:[%s1793_s2 + $0x68] sm:$0xf]  ;;  %v1009_v31 = vor.u32 %v1180_v22, %v1008_v21 }
  0x21   :  { %384 = vmatpush.bf16.msrb.mxu3 %v937_v35  ;;  %v1181_v28 = vld [vmem:[%s1793_s2 + $0x74] sm:$0xf0]  ;;  %v1179_v29 = vld [vmem:[%s1793_s2 + $0x6c] sm:$0xf]  ;;  %v1018_v30 = vld [vmem:[%s1793_s2 + $0x78] sm:$0xf0]  ;;  %v1013_v32 = vor.u32 %v1178_v23, %v1010_v25 }
  0x22   :  { %346 = vmatpush.bf16.msrb.mxu0 %v909_v41  ;;  %v1017_v33 = vor.u32 %v1181_v28, %v1016_v27  ;;  %v992_v34 = vld [vmem:[%s1793_s2 + $0x40] sm:$0xf]  ;;  %v1176_v35 = vld [vmem:[%s1793_s2 + $0x4c] sm:$0xf0]  ;;  %v1174_v36 = vld [vmem:[%s1793_s2 + $0x44] sm:$0xf]  ;;  %v1021_v37 = vor.u32 %v1179_v29, %v1018_v30 }
  0x23   :  { %359 = vmatpush.bf16.msrb.mxu1 %v913_v44  ;;  %v994_v38 = vld [vmem:[%s1793_s2 + $0x50] sm:$0xf0]  ;;  %v1000_v39 = vld [vmem:[%s1793_s2 + $0x48] sm:$0xf]  ;;  %v1177_v40 = vld [vmem:[%s1793_s2 + $0x54] sm:$0xf0]  ;;  %v993_v43 = vor.u32 %v1176_v35, %v992_v34 }
  0x24   :  { %372 = vmatpush.bf16.msrb.mxu2 %v917_v45  ;;  %v1175_v41 = vld [vmem:[%s1793_s2 + $0x4c] sm:$0xf]  ;;  %v1002_v42 = vld [vmem:[%s1793_s2 + $0x58] sm:$0xf0]  ;;  %v976_v44 = vld [vmem:[%s1793_s2 + $0x20] sm:$0xf]  ;;  %v997_v46 = vor.u32 %v1174_v36, %v994_v38  ;;  %v1001_v47 = vor.u32 %v1177_v40, %v1000_v39 }
  0x25   :  { %385 = vmatpush.bf16.msrb.mxu3 %v921_v49  ;;  %v1172_v45 = vld [vmem:[%s1793_s2 + $0x2c] sm:$0xf0]  ;;  %v1170_v48 = vld [vmem:[%s1793_s2 + $0x24] sm:$0xf]  ;;  %v978_v49 = vld [vmem:[%s1793_s2 + $0x30] sm:$0xf0]  ;;  %v1005_v51 = vor.u32 %v1175_v41, %v1002_v42 }
  0x26   :  { %347 = vmatpush.bf16.msrb.mxu0 %v893_v58  ;;  %v984_v50 = vld [vmem:[%s1793_s2 + $0x28] sm:$0xf]  ;;  %v1173_v52 = vld [vmem:[%s1793_s2 + $0x34] sm:$0xf0]  ;;  %v1171_v53 = vld [vmem:[%s1793_s2 + $0x2c] sm:$0xf]  ;;  %v977_v60 = vor.u32 %v1172_v45, %v976_v44  ;;  %v981_v0 = vor.u32 %v1170_v48, %v978_v49 }
  0x27   :  { %360 = vmatpush.bf16.msrb.mxu1 %v897_v62  ;;  %v986_v54 = vld [vmem:[%s1793_s2 + $0x38] sm:$0xf0]  ;;  %v960_v55 = vld [vmem:[%s1793_s2] sm:$0xf]  ;;  %v1168_v56 = vld [vmem:[%s1793_s2 + $0xc] sm:$0xf0]  ;;  %v985_v1 = vor.u32 %v1173_v52, %v984_v50 }
  0x28   :  { %373 = vmatpush.bf16.msrb.mxu2 %v901_v63  ;;  %v1108_v57 = vld [vmem:[%s1794_s3 + $0x80] sm:$0xf]  ;;  %v1204_v58 = vld [vmem:[%s1794_s3 + $0x8c] sm:$0x30]  ;;  %v1202_v59 = vld [vmem:[%s1794_s3 + $0x84] sm:$0xf]  ;;  %v989_v6 = vor.u32 %v1171_v53, %v986_v54 }
  0x29   :  { %386 = vmatpush.bf16.msrb.mxu3 %v905_v3  ;;  %v1110_v61 = vld [vmem:[%s1794_s3 + $0x90] sm:$0x30]  ;;  %v1116_v62 = vld [vmem:[%s1794_s3 + $0x88] sm:$0xf]  ;;  %v1205_v63 = vld [vmem:[%s1794_s3 + $0x94] sm:$0x30]  ;;  %v1109_v10 = vor.u32 %v1204_v58, %v1108_v57 }
  0x2a   :  { %348 = vmatpush.bf16.msrb.mxu0 %v877_v13  ;;  %v1166_v2 = vld [vmem:[%s1793_s2 + $0x4] sm:$0xf]  ;;  %v1203_v3 = vld [vmem:[%s1794_s3 + $0x8c] sm:$0xf]  ;;  %v1118_v4 = vld [vmem:[%s1794_s3 + $0x98] sm:$0x30]  ;;  %v1113_v13 = vor.u32 %v1202_v59, %v1110_v61  ;;  %v1117_v14 = vor.u32 %v1205_v63, %v1116_v62 }
  0x2b   :  { %361 = vmatpush.bf16.msrb.mxu1 %v881_v15  ;;  %v962_v7 = vld [vmem:[%s1793_s2 + $0x10] sm:$0xf0]  ;;  %v968_v8 = vld [vmem:[%s1793_s2 + $0x8] sm:$0xf]  ;;  %v1169_v9 = vld [vmem:[%s1793_s2 + $0x14] sm:$0xf0]  ;;  %v961_v15 = vor.u32 %v1168_v56, %v960_v55  ;;  %v690_v21 = vand.u32 %v1109_v10, %v1252_v5 }
  0x2c   :  { %374 = vmatpush.bf16.msrb.mxu2 %v885_v16  ;;  %v1167_v11 = vld [vmem:[%s1793_s2 + $0xc] sm:$0xf]  ;;  %v970_v12 = vld [vmem:[%s1793_s2 + $0x18] sm:$0xf0]  ;;  %v1121_v16 = vor.u32 %v1203_v3, %v1118_v4  ;;  %v1210_v22 = vmov 0   ;;  %v693_v23 = vand.u32 %v1113_v13, %v1252_v5  ;;  %vm784_vm5 = vmor %vm783_vm4, %vm782_vm3 }
  0x2d   :  { %387 = vmatpush.bf16.msrb.mxu3 %v889_v17  ;;  %954 = vmatmul.msk.bf16.vlgmr.msrb.gmra.mxu0 %vm141_vm2, %v1421_v26  ;;  %v965_v17 = vor.u32 %v1166_v2, %v962_v7  ;;  %v1092_v25 = vld [vmem:[%s1794_s3 + $0x60] sm:$0xf]  ;;  %v1200_v27 = vld [vmem:[%s1794_s3 + $0x6c] sm:$0xf0]  ;;  %v1198_v28 = vld [vmem:[%s1794_s3 + $0x64] sm:$0xf] }
  0x2e   :  { %524 = vmatpush.bf16.msra.mxu0 %v510_v18  ;;  %955 = vmatmul.msk.bf16.vlgmr.msrb.gmra.mxu1 %vm141_vm2, %v1421_v26  ;;  %v969_v18 = vor.u32 %v1169_v9, %v968_v8  ;;  %v699_v29 = vand.u32 %v1121_v16, %v1252_v5  ;;  %v1094_v30 = vld [vmem:[%s1794_s3 + $0x70] sm:$0xf0]  ;;  %v1093_v34 = vor.u32 %v1200_v27, %v1092_v25  ;;  %v1196_v38 = vld [vmem:[%s1794_s3 + $0x4c] sm:$0xf0]  ;;  %v1194_v39 = vld [vmem:[%s1794_s3 + $0x44] sm:$0xf] }
  0x2f   :  { %537 = vmatpush.bf16.msra.mxu1 %v513_v19  ;;  %956 = vmatmul.msk.bf16.vlgmr.msrb.gmra.mxu2 %vm141_vm2, %v1421_v26  ;;  %v765_v19 = vld [vmem:[%s1795_s5] sm:$0x3f]  ;;  %v1097_v35 = vor.u32 %v1198_v28, %v1094_v30  ;;  %v1078_v41 = vld [vmem:[%s1794_s3 + $0x50] sm:$0xf0]  ;;  %v1084_v42 = vld [vmem:[%s1794_s3 + $0x48] sm:$0xf] }
  0x30   :  { %550 = vmatpush.bf16.msra.mxu2 %v516_v20  ;;  %957 = vmatmul.msk.bf16.vlgmr.msrb.gmra.mxu3 %vm141_vm2, %v1421_v26  ;;  %v973_v20 = vor.u32 %v1167_v11, %v970_v12  ;;  %v1195_v44 = vld [vmem:[%s1794_s3 + $0x4c] sm:$0xf]  ;;  %v1086_v45 = vld [vmem:[%s1794_s3 + $0x58] sm:$0xf0]  ;;  %v1060_v49 = vld [vmem:[%s1794_s3 + $0x20] sm:$0xf] }
  0x31   :  { %563 = vmatpush.bf16.msra.mxu3 %v519_v24  ;;  %1208 = vset.pattern.permute.xlu0 %v1210_v22  ;;  %v696_v24 = vand.u32 %v1117_v14, %v1252_v5  ;;  %v1102_v5 = vld [vmem:[%s1794_s3 + $0x78] sm:$0xf0]  ;;  %v1192_v50 = vld [vmem:[%s1794_s3 + $0x2c] sm:$0xf0]  ;;  %v1089_v52 = vor.u32 %v1195_v44, %v1086_v45  ;;  %v1062_v53 = vld [vmem:[%s1794_s3 + $0x30] sm:$0xf0] }
  0x32   :  { %525 = vmatpush.bf16.msra.mxu0 %v1009_v31  ;;  %768 = vperm.xlu0 %1208, %v765_v19   ;;  %v1100_v31 = vld [vmem:[%s1794_s3 + $0x68] sm:$0xf]  ;;  %v1193_v55 = vld [vmem:[%s1794_s3 + $0x34] sm:$0xf0]  ;;  %v1191_v56 = vld [vmem:[%s1794_s3 + $0x2c] sm:$0xf]  ;;  %v1061_v58 = vor.u32 %v1192_v50, %v1060_v49 }
  0x33   :  { %538 = vmatpush.bf16.msra.mxu1 %v1013_v32  ;;  %v1201_v32 = vld [vmem:[%s1794_s3 + $0x74] sm:$0xf0]  ;;  %v1068_v54 = vld [vmem:[%s1794_s3 + $0x28] sm:$0xf]  ;;  %v1070_v57 = vld [vmem:[%s1794_s3 + $0x38] sm:$0xf0] }
  0x34   :  { %551 = vmatpush.bf16.msra.mxu2 %v1017_v33  ;;  %v1199_v33 = vld [vmem:[%s1794_s3 + $0x6c] sm:$0xf]  ;;  %v1101_v36 = vor.u32 %v1201_v32, %v1100_v31  ;;  %v1044_v61 = vld [vmem:[%s1794_s3] sm:$0xf]  ;;  %v1188_v62 = vld [vmem:[%s1794_s3 + $0xc] sm:$0xf0] }
  0x35   :  { %564 = vmatpush.bf16.msra.mxu3 %v1021_v37  ;;  %v1076_v37 = vld [vmem:[%s1794_s3 + $0x40] sm:$0xf]  ;;  %v1105_v40 = vor.u32 %v1199_v33, %v1102_v5  ;;  %v1186_v63 = vld [vmem:[%s1794_s3 + $0x4] sm:$0xf]  ;;  %v1052_v2 = vld [vmem:[%s1794_s3 + $0x8] sm:$0xf]  ;;  %v1045_v7 = vor.u32 %v1188_v62, %v1044_v61 }
  0x36   :  { %526 = vmatpush.bf16.msra.mxu0 %v993_v43  ;;  %v1197_v43 = vld [vmem:[%s1794_s3 + $0x54] sm:$0xf0]  ;;  %v1187_v4 = vld [vmem:[%s1794_s3 + $0xc] sm:$0xf] }
  0x37   :  { %539 = vmatpush.bf16.msra.mxu1 %v997_v46  ;;  %v1077_v46 = vor.u32 %v1196_v38, %v1076_v37  ;;  %v1085_v48 = vor.u32 %v1197_v43, %v1084_v42  ;;  %v1189_v3 = vld [vmem:[%s1794_s3 + $0x14] sm:$0xf0] }
  0x38   :  { %552 = vmatpush.bf16.msra.mxu2 %v1001_v47  ;;  %v1081_v47 = vor.u32 %v1194_v39, %v1078_v41  ;;  %v1053_v9 = vor.u32 %v1189_v3, %v1052_v2 }
  0x39   :  { %565 = vmatpush.bf16.msra.mxu3 %v1005_v51  ;;  %v1190_v51 = vld [vmem:[%s1794_s3 + $0x24] sm:$0xf] }
  0x3a   :  { %527 = vmatpush.bf16.msra.mxu0 %v977_v60  ;;  %v1065_v59 = vor.u32 %v1190_v51, %v1062_v53  ;;  %v1069_v60 = vor.u32 %v1193_v55, %v1068_v54 }
  0x3b   :  { %540 = vmatpush.bf16.msra.mxu1 %v981_v0  ;;  %v1073_v0 = vor.u32 %v1191_v56, %v1070_v57 }
  0x3c   :  { %553 = vmatpush.bf16.msra.mxu2 %v985_v1  ;;  %v1046_v1 = vld [vmem:[%s1794_s3 + $0x10] sm:$0xf0] }
  0x3d   :  { %566 = vmatpush.bf16.msra.mxu3 %v989_v6  ;;  %v1054_v6 = vld [vmem:[%s1794_s3 + $0x18] sm:$0xf0]  ;;  %v1049_v8 = vor.u32 %v1186_v63, %v1046_v1 }
  0x3e   :  { %528 = vmatpush.bf16.msra.mxu0 %v961_v15  ;;  %v1057_v10 = vor.u32 %v1187_v4, %v1054_v6 }
  0x3f   :  { %541 = vmatpush.bf16.msra.mxu1 %v965_v17 }
  0x40   :  { %554 = vmatpush.bf16.msra.mxu2 %v969_v18 }
  0x41   :  { %567 = vmatpush.bf16.msra.mxu3 %v973_v20  ;;  %1038 = vmatmul.msk.bf16.vlgmr.msra.gmra.mxu0 %vm141_vm2, %v1421_v26 }
  0x42   :  { %704 = vmatpush.bf16.msrb.mxu0 %v690_v21  ;;  %1039 = vmatmul.msk.bf16.vlgmr.msra.gmra.mxu1 %vm141_vm2, %v1421_v26 }
  0x43   :  { %717 = vmatpush.bf16.msrb.mxu1 %v693_v23  ;;  %1040 = vmatmul.msk.bf16.vlgmr.msra.gmra.mxu2 %vm141_vm2, %v1421_v26 }
  0x44   :  { %730 = vmatpush.bf16.msrb.mxu2 %v696_v24  ;;  %1041 = vmatmul.msk.bf16.vlgmr.msra.gmra.mxu3 %vm141_vm2, %v1421_v26 }
  0x45   :  { %743 = vmatpush.bf16.msrb.mxu3 %v699_v29 }
  0x46   :  { %705 = vmatpush.bf16.msrb.mxu0 %v1093_v34 }
  0x47   :  { %718 = vmatpush.bf16.msrb.mxu1 %v1097_v35 }
  0x48   :  { %731 = vmatpush.bf16.msrb.mxu2 %v1101_v36 }
  0x49   :  { %744 = vmatpush.bf16.msrb.mxu3 %v1105_v40 }
  0x4a   :  { %706 = vmatpush.bf16.msrb.mxu0 %v1077_v46 }
  0x4b   :  { %719 = vmatpush.bf16.msrb.mxu1 %v1081_v47 }
  0x4c   :  { %732 = vmatpush.bf16.msrb.mxu2 %v1085_v48 }
  0x4d   :  { %745 = vmatpush.bf16.msrb.mxu3 %v1089_v52 }
  0x4e   :  { %707 = vmatpush.bf16.msrb.mxu0 %v1061_v58 }
  0x4f   :  { %720 = vmatpush.bf16.msrb.mxu1 %v1065_v59 }
  0x50   :  { %733 = vmatpush.bf16.msrb.mxu2 %v1069_v60 }
  0x51   :  { %746 = vmatpush.bf16.msrb.mxu3 %v1073_v0 }
  0x52   :  { %708 = vmatpush.bf16.msrb.mxu0 %v1045_v7 }
  0x53   :  { %721 = vmatpush.bf16.msrb.mxu1 %v1049_v8 }
  0x54   :  { %734 = vmatpush.bf16.msrb.mxu2 %v1053_v9 }
  0x55   :  { %747 = vmatpush.bf16.msrb.mxu3 %v1057_v10  ;;  %1122 = vmatmul.msk.bf16.vlgmr.msrb.gmra.mxu0 %vm141_vm2, %v1421_v26 }
  0x56   :  { %1123 = vmatmul.msk.bf16.vlgmr.msrb.gmra.mxu1 %vm141_vm2, %v1421_v26 }
  0x57   :  { %1124 = vmatmul.msk.bf16.vlgmr.msrb.gmra.mxu2 %vm141_vm2, %v1421_v26 }
  0x58   :  { %1125 = vmatmul.msk.bf16.vlgmr.msrb.gmra.mxu3 %vm141_vm2, %v1421_v26 }
  0x96   :  { %v170_v11 = vpop.f32.mrf.mxu0 }
  0x97   :  { %v183_v12 = vpop.f32.mrf.mxu1 }
  0x9e   :  { %v196_v13 = vpop.f32.mrf.mxu2  ;;  %v172_v15 = vpop.f32.mrf.mxu0 }
  0x9f   :  { %v209_v14 = vpop.f32.mrf.mxu3  ;;  %v185_v16 = vpop.f32.mrf.mxu1 }
  0xa4   :  { %v769_v40 = vpop.permute.xlu0 %768 }
  0xa6   :  { %v198_v17 = vpop.f32.mrf.mxu2 }
  0xa7   :  { %v211_v18 = vpop.f32.mrf.mxu3 }
  0xaa   :  { %v350_v19 = vpop.f32.mrf.mxu0 }
  0xab   :  { %v363_v20 = vpop.f32.mrf.mxu1  ;;  %v753_v35 = vmax.f32 %v170_v11, %v350_v19 }
  0xac   :  { %v754_v38 = vmax.f32 %v183_v12, %v363_v20 }
  0xb2   :  { %v376_v21 = vpop.f32.mrf.mxu2  ;;  %v352_v23 = vpop.f32.mrf.mxu0 }
  0xb3   :  { %v389_v22 = vpop.f32.mrf.mxu3  ;;  %v365_v24 = vpop.f32.mrf.mxu1  ;;  %v755_v47 = vmax.f32 %v196_v13, %v376_v21 }
  0xb4   :  { %v756_v52 = vmax.f32 %v209_v14, %v389_v22 }
  0xba   :  { %v378_v25 = vpop.f32.mrf.mxu2 }
  0xbb   :  { %v391_v27 = vpop.f32.mrf.mxu3 }
  0xbe   :  { %v530_v28 = vpop.f32.mrf.mxu0 }
  0xbf   :  { %v543_v29 = vpop.f32.mrf.mxu1 }
  0xc6   :  { %v556_v30 = vpop.f32.mrf.mxu2  ;;  %v532_v31 = vpop.f32.mrf.mxu0 }
  0xc7   :  { %v569_v26 = vpop.f32.mrf.mxu3  ;;  %v545_v32 = vpop.f32.mrf.mxu1 }
  0xce   :  { %v558_v33 = vpop.f32.mrf.mxu2 }
  0xcf   :  { %v571_v5 = vpop.f32.mrf.mxu3 }
  0xd2   :  { %v710_v34 = vpop.f32.mrf.mxu0 }
  0xd3   :  { %v757_v36 = vmax.f32 %v530_v28, %v710_v34  ;;  %v723_v37 = vpop.f32.mrf.mxu1 }
  0xd4   :  { %v758_v39 = vmax.f32 %v543_v29, %v723_v37 }
  0xd5   :  { %v761_v41 = vmax.f32 %v753_v35, %v757_v36 }
  0xd6   :  { %v762_v42 = vmax.f32 %v754_v38, %v758_v39 }
  0xd7   :  { %v771_v43 = vadd.f32 %v769_v40, %v761_v41 }
  0xd8   :  { %v772_v44 = vadd.f32 %v769_v40, %v762_v42 }
  0xd9   :  { %v775_v45 = vmax.f32 %v771_v43, 0.0 }
  0xda   :  { %v736_v46 = vpop.f32.mrf.mxu2  ;;  %v776_v48 = vmax.f32 %v772_v44, 0.0  ;;  %v712_v51 = vpop.f32.mrf.mxu0 }
  0xdb   :  { %v759_v49 = vmax.f32 %v556_v30, %v736_v46  ;;  %v749_v50 = vpop.f32.mrf.mxu3  ;;  %v725_v54 = vpop.f32.mrf.mxu1 }
  0xdc   :  { %v760_v53 = vmax.f32 %v569_v26, %v749_v50  ;;  %v779_v55 = vpack.c.bf16 %v776_v48, %v775_v45 }
  0xdd   :  { %v763_v56 = vmax.f32 %v755_v47, %v759_v49 }
  0xde   :  { %v764_v57 = vmax.f32 %v756_v52, %v760_v53  ;;  %781 = vst [vmem:[%s1796_s6] sm:$0x77] %v779_v55 }
  0xdf   :  { %v773_v58 = vadd.f32 %v769_v40, %v763_v56 }
  0xe0   :  { %v774_v59 = vadd.f32 %v769_v40, %v764_v57 }
  0xe1   :  { %v777_v60 = vmax.f32 %v773_v58, 0.0 }
  0xe2   :  { %v778_v61 = vmax.f32 %v774_v59, 0.0  ;;  %v738_v62 = vpop.f32.mrf.mxu2 }
  0xe3   :  { %v751_v63 = vpop.f32.mrf.mxu3 }
  0xe4   :  { %v780_v0 = vpack.c.bf16 %v778_v61, %v777_v60 }
  0xe6   :  { %785 = vst.msk [vmem:[%s1796_s6 + $0x8] sm:$0x77] %vm784_vm5, %v780_v0 }

// kernel: net_forward.4
= control target key start
LH: loop header
LB: loop body
LE: loop exit
PB: predicated region body
PF: predicated region fallthrough
CT: control target
= control target key end

     0   :  { %vm115_vm0 = vcmask 1042432   ;;  %vm111_vm1 = vcmask 179200   ;;  %v695_v34 = vmov 0   ;;  %vm492_vm2 = vcmask 404480   ;;  %s889_s0 = inlined_call_operand.vmem [shape: bf16[150,50], index: 0, kind: input, shape index: {}]   ;;  %s890_s1 = inlined_call_operand.vmem [shape: bf16[150,50], index: 1, kind: input, shape index: {}]   ;;  %s891_s2 = inlined_call_operand.vmem [shape: bf16[150,50], index: 2, kind: input, shape index: {}]   ;;  %s892_s3 = inlined_call_operand.vmem [shape: bf16[150,50], index: 3, kind: input, shape index: {}]   ;;  %s893_s4 = inlined_call_operand.vmem [shape: bf16[16,150], index: 4, kind: input, shape index: {}]   ;;  %s894_s5 = inlined_call_operand.vmem [shape: f32[16,1], index: 5, kind: input, shape index: {}]   ;;  %s895_s6 = inlined_call_operand.vmem [shape: bf16[16,50], index: 6, kind: output, shape index: {}]  }
   0x1   :  { %v664_v0 = vld [vmem:[%s889_s0 + $0x38] sm:$0xff]  ;;  %v44_v2 = vld [vmem:[%s889_s0 + $0x48] sm:$0x7]  ;;  %v663_v6 = vld [vmem:[%s889_s0 + $0x30] sm:$0xff]  ;;  %694 = vset.pattern.permute.xlu0 %v695_v34 }
   0x2   :  { %v673_v1 = vld [vmem:[%s890_s1 + $0x38] sm:$0xff]  ;;  %v91_v3 = vunpack.c.l.b16 %v44_v2  ;;  %v272_v4 = vld [vmem:[%s891_s2 + $0x48] sm:$0x7]  ;;  %119 = vmatpush.bf16.msra.mxu0 %v664_v0  ;;  %v672_v8 = vld [vmem:[%s890_s1 + $0x30] sm:$0xff] }
   0x3   :  { %226 = vmatpush.bf16.msra.mxu2 %v673_v1  ;;  %v310_v5 = vunpack.c.l.b16 %v272_v4  ;;  %v665_v12 = vld [vmem:[%s889_s0 + $0x40] sm:$0xff]  ;;  %v662_v13 = vld [vmem:[%s889_s0 + $0x28] sm:$0xff]  ;;  %v682_v16 = vld [vmem:[%s891_s2 + $0x38] sm:$0xff] }
   0x4   :  { %v101_v7 = vpack.c.b16 %v91_v3, %v91_v3  ;;  %v683_v14 = vld [vmem:[%s891_s2 + $0x40] sm:$0xff]  ;;  %v671_v15 = vld [vmem:[%s890_s1 + $0x28] sm:$0xff]  ;;  %v691_v17 = vld [vmem:[%s892_s3 + $0x38] sm:$0xff] }
   0x5   :  { %v320_v9 = vpack.c.b16 %v310_v5, %v310_v5  ;;  %v655_v18 = vld [vmem:[%s893_s4 + $0x4] sm:$0xf]  ;;  %v503_v19 = vld [vmem:[%s893_s4 + $0x8] sm:$0xf0]  ;;  %v681_v23 = vld [vmem:[%s891_s2 + $0x30] sm:$0xff] }
   0x6   :  { %v117_v10 = vsel %vm115_vm0, %v101_v7, 0  ;;  %120 = vmatpush.bf16.msra.mxu0 %v663_v6  ;;  %v775_v20 = vor.u32 %v655_v18, %v503_v19  ;;  %v661_v21 = vld [vmem:[%s889_s0 + $0x20] sm:$0xff]  ;;  %v690_v24 = vld [vmem:[%s892_s3 + $0x30] sm:$0xff]  ;;  %v660_v25 = vld [vmem:[%s889_s0 + $0x18] sm:$0xff] }
   0x7   :  { %139 = vmatpush.bf16.msra.mxu1 %v117_v10  ;;  %v331_v11 = vsel %vm115_vm0, %v320_v9, 0  ;;  %227 = vmatpush.bf16.msra.mxu2 %v672_v8  ;;  %v670_v22 = vld [vmem:[%s890_s1 + $0x20] sm:$0xff]  ;;  %v669_v26 = vld [vmem:[%s890_s1 + $0x18] sm:$0xff]  ;;  %v680_v27 = vld [vmem:[%s891_s2 + $0x28] sm:$0xff] }
   0x8   :  { %353 = vmatpush.bf16.msra.mxu3 %v331_v11  ;;  %v689_v28 = vld [vmem:[%s892_s3 + $0x28] sm:$0xff]  ;;  %v659_v30 = vld [vmem:[%s889_s0 + $0x10] sm:$0xff]  ;;  %v474_v31 = vld [vmem:[%s894_s5] sm:$0xff] }
   0x9   :  { %v379_v29 = vld [vmem:[%s892_s3 + $0x48] sm:$0x7]  ;;  %v668_v32 = vld [vmem:[%s890_s1 + $0x10] sm:$0xff]  ;;  %v679_v35 = vld [vmem:[%s891_s2 + $0x20] sm:$0xff]  ;;  %478 = vperm.xlu0 %694, %v474_v31  }
   0xa   :  { %121 = vmatpush.bf16.msra.mxu0 %v662_v13  ;;  %v165_v33 = vld [vmem:[%s890_s1 + $0x48] sm:$0x7]  ;;  %v688_v36 = vld [vmem:[%s892_s3 + $0x20] sm:$0xff]  ;;  %v417_v37 = vunpack.c.l.b16 %v379_v29  ;;  %v678_v41 = vld [vmem:[%s891_s2 + $0x18] sm:$0xff] }
   0xb   :  { %140 = vmatpush.bf16.msra.mxu1 %v665_v12  ;;  %228 = vmatpush.bf16.msra.mxu2 %v671_v15  ;;  %v658_v38 = vld [vmem:[%s889_s0 + $0x8] sm:$0xff]  ;;  %v203_v39 = vunpack.c.l.b16 %v165_v33  ;;  %v687_v42 = vld [vmem:[%s892_s3 + $0x18] sm:$0xff]  ;;  %v657_v44 = vld [vmem:[%s889_s0] sm:$0xff] }
   0xc   :  { %354 = vmatpush.bf16.msra.mxu3 %v683_v14  ;;  %v667_v40 = vld [vmem:[%s890_s1 + $0x8] sm:$0xff]  ;;  %v427_v43 = vpack.c.b16 %v417_v37, %v417_v37  ;;  %v501_v45 = vld [vmem:[%s893_s4] sm:$0xf]  ;;  %v677_v50 = vld [vmem:[%s891_s2 + $0x10] sm:$0xff] }
   0xd   :  { %v656_v46 = vld [vmem:[%s893_s4 + $0x4] sm:$0xf0]  ;;  %v213_v47 = vpack.c.b16 %v203_v39, %v203_v39  ;;  %v666_v49 = vld [vmem:[%s890_s1] sm:$0xff]  ;;  %v686_v51 = vld [vmem:[%s892_s3 + $0x10] sm:$0xff] }
   0xe   :  { %543 = vmatmul.msk.bf16.vlgmr.msra.gmra.mxu1 %vm111_vm1, %v775_v20  ;;  %122 = vmatpush.bf16.msra.mxu0 %v661_v21  ;;  %v475_v48 = vld [vmem:[%s894_s5 + $0x8] sm:$0xff]  ;;  %v438_v52 = vsel %vm115_vm0, %v427_v43, 0  ;;  %v502_v53 = vor.u32 %v656_v46, %v501_v45  ;;  %v692_v55 = vld [vmem:[%s892_s3 + $0x40] sm:$0xff] }
   0xf   :  { %333 = vmatpush.bf16.msrb.mxu1 %v682_v16  ;;  %617 = vmatmul.msk.bf16.vlgmr.msra.gmra.mxu3 %vm111_vm1, %v775_v20  ;;  %v224_v54 = vsel %vm115_vm0, %v213_v47, 0  ;;  %v676_v56 = vld [vmem:[%s891_s2 + $0x8] sm:$0xff]  ;;  %v674_v58 = vld [vmem:[%s890_s1 + $0x40] sm:$0xff] }
  0x10   :  { %440 = vmatpush.bf16.msrb.mxu3 %v691_v17  ;;  %229 = vmatpush.bf16.msra.mxu2 %v670_v22  ;;  %v685_v57 = vld [vmem:[%s892_s3 + $0x8] sm:$0xff]  ;;  %v675_v59 = vld [vmem:[%s891_s2] sm:$0xff] }
  0x11   :  { %483 = vperm.xlu0 %694, %v475_v48   ;;  %v684_v60 = vld [vmem:[%s892_s3] sm:$0xff] }
  0x12   :  { %123 = vmatpush.bf16.msra.mxu0 %v660_v25 }
  0x13   :  { %334 = vmatpush.bf16.msrb.mxu1 %v681_v23 }
  0x14   :  { %441 = vmatpush.bf16.msrb.mxu3 %v690_v24  ;;  %230 = vmatpush.bf16.msra.mxu2 %v669_v26 }
  0x16   :  { %124 = vmatpush.bf16.msra.mxu0 %v659_v30 }
  0x17   :  { %335 = vmatpush.bf16.msrb.mxu1 %v680_v27 }
  0x18   :  { %442 = vmatpush.bf16.msrb.mxu3 %v689_v28  ;;  %231 = vmatpush.bf16.msra.mxu2 %v668_v32 }
  0x1a   :  { %125 = vmatpush.bf16.msra.mxu0 %v658_v38 }
  0x1b   :  { %336 = vmatpush.bf16.msrb.mxu1 %v679_v35 }
  0x1c   :  { %443 = vmatpush.bf16.msrb.mxu3 %v688_v36  ;;  %232 = vmatpush.bf16.msra.mxu2 %v667_v40 }
  0x1e   :  { %126 = vmatpush.bf16.msra.mxu0 %v657_v44 }
  0x1f   :  { %337 = vmatpush.bf16.msrb.mxu1 %v678_v41 }
  0x20   :  { %444 = vmatpush.bf16.msrb.mxu3 %v687_v42  ;;  %233 = vmatpush.bf16.msra.mxu2 %v666_v49 }
  0x21   :  { %127 = vmatmul.bf16.vlgmr.msra.gmra.mxu0 %v502_v53 }
  0x22   :  { %460 = vmatpush.bf16.msrb.mxu0 %v438_v52 }
  0x23   :  { %338 = vmatpush.bf16.msrb.mxu1 %v677_v50  ;;  %234 = vmatmul.bf16.vlgmr.msra.gmra.mxu2 %v502_v53 }
  0x24   :  { %445 = vmatpush.bf16.msrb.mxu3 %v686_v51  ;;  %246 = vmatpush.bf16.msrb.mxu2 %v224_v54 }
  0x26   :  { %461 = vmatpush.bf16.msrb.mxu0 %v692_v55 }
  0x27   :  { %339 = vmatpush.bf16.msrb.mxu1 %v676_v56 }
  0x28   :  { %446 = vmatpush.bf16.msrb.mxu3 %v685_v57  ;;  %247 = vmatpush.bf16.msrb.mxu2 %v674_v58 }
  0x2b   :  { %340 = vmatpush.bf16.msrb.mxu1 %v675_v59 }
  0x2c   :  { %447 = vmatpush.bf16.msrb.mxu3 %v684_v60 }
  0x2e   :  { %341 = vmatmul.bf16.vlgmr.msrb.gmra.mxu1 %v502_v53 }
  0x2f   :  { %448 = vmatmul.bf16.vlgmr.msrb.gmra.mxu3 %v502_v53 }
  0x31   :  { %654 = vmatmul.msk.bf16.vlgmr.msrb.gmra.mxu0 %vm111_vm1, %v775_v20 }
  0x33   :  { %580 = vmatmul.msk.bf16.vlgmr.msrb.gmra.mxu2 %vm111_vm1, %v775_v20 }
  0x7b   :  { %v479_v14 = vpop.permute.xlu0 %478 }
  0x83   :  { %v484_v31 = vpop.permute.xlu0 %483 }
  0x8b   :  { %v142_v62 = vpop.f32.mrf.mxu1 }
  0x92   :  { %v356_v61 = vpop.f32.mrf.mxu3 }
  0x93   :  { %v144_v3 = vpop.f32.mrf.mxu1 }
  0x9a   :  { %v358_v1 = vpop.f32.mrf.mxu3 }
  0x9e   :  { %v128_v63 = vpop.f32.mrf.mxu0 }
  0x9f   :  { %v143_v10 = vadd.f32 %v142_v62, %v128_v63 }
  0xa6   :  { %v235_v0 = vpop.f32.mrf.mxu2  ;;  %v130_v2 = vpop.f32.mrf.mxu0 }
  0xa7   :  { %v145_v23 = vadd.f32 %v144_v3, %v130_v2 }
  0xab   :  { %v342_v7 = vpop.f32.mrf.mxu1 }
  0xac   :  { %v357_v11 = vadd.f32 %v356_v61, %v342_v7 }
  0xae   :  { %v237_v4 = vpop.f32.mrf.mxu2  ;;  %v463_v6 = vpop.f32.mrf.mxu0 }
  0xb2   :  { %v449_v5 = vpop.f32.mrf.mxu3 }
  0xb3   :  { %v464_v8 = vadd.f32 %v463_v6, %v449_v5  ;;  %v344_v19 = vpop.f32.mrf.mxu1 }
  0xb4   :  { %v359_v24 = vadd.f32 %v358_v1, %v344_v19 }
  0xb5   :  { %v470_v13 = vmax.f32 %v357_v11, %v464_v8 }
  0xb6   :  { %v249_v9 = vpop.f32.mrf.mxu2  ;;  %v465_v17 = vpop.f32.mrf.mxu0 }
  0xb7   :  { %v250_v12 = vadd.f32 %v249_v9, %v235_v0 }
  0xb9   :  { %v468_v15 = vmax.f32 %v143_v10, %v250_v12 }
  0xba   :  { %v451_v16 = vpop.f32.mrf.mxu3 }
  0xbb   :  { %v472_v18 = vmax.f32 %v468_v15, %v470_v13  ;;  %v466_v21 = vadd.f32 %v465_v17, %v451_v16 }
  0xbd   :  { %v486_v20 = vadd.f32 %v479_v14, %v472_v18  ;;  %v471_v28 = vmax.f32 %v359_v24, %v466_v21 }
  0xbe   :  { %v251_v22 = vpop.f32.mrf.mxu2 }
  0xbf   :  { %v488_v25 = vmax.f32 %v486_v20, 0.0  ;;  %v252_v26 = vadd.f32 %v251_v22, %v237_v4 }
  0xc1   :  { %v490_v27 = vpack.c.bf16 %v488_v25, %v488_v25  ;;  %v469_v29 = vmax.f32 %v145_v23, %v252_v26 }
  0xc3   :  { %493 = vst.msk [vmem:[%s895_s6] sm:$0xf] %vm492_vm2, %v490_v27  ;;  %v473_v30 = vmax.f32 %v469_v29, %v471_v28 }
  0xc5   :  { %v487_v32 = vadd.f32 %v484_v31, %v473_v30 }
  0xc7   :  { %v489_v33 = vmax.f32 %v487_v32, 0.0 }
  0xc9   :  { %v491_v34 = vpack.c.bf16 %v489_v33, %v489_v33 }
  0xcb   :  { %494 = vst.msk [vmem:[%s895_s6 + $0x4] sm:$0xf] %vm492_vm2, %v491_v34 }

// kernel: net_forward.5
= control target key start
LH: loop header
LB: loop body
LE: loop exit
PB: predicated region body
PF: predicated region fallthrough
CT: control target
= control target key end

     0   :  { %vm367_vm0 = vcmask 1043456   ;;  %s864_s0 = inlined_call_operand.vmem [shape: bf16[2,400], index: 0, kind: input, shape index: {}]   ;;  %s865_s1 = inlined_call_operand.vmem [shape: bf16[400,120], index: 1, kind: input, shape index: {}]   ;;  %s866_s2 = inlined_call_operand.vmem [shape: f32[1,120], index: 2, kind: input, shape index: {}]   ;;  %s867_s3 = inlined_call_operand.vmem [shape: bf16[120,84], index: 3, kind: input, shape index: {}]   ;;  %s868_s4 = inlined_call_operand.vmem [shape: f32[1,84], index: 4, kind: input, shape index: {}]   ;;  %s869_s5 = inlined_call_operand.vmem [shape: bf16[84,10], index: 5, kind: input, shape index: {}]   ;;  %s870_s6 = inlined_call_operand.vmem [shape: f32[1,10], index: 6, kind: input, shape index: {}]   ;;  %s871_s7 = inlined_call_operand.hbm [shape: f32[2,10], index: 7, kind: output, shape index: {}]  }
   0x1   :  { %v631_v0 = vld [vmem:[%s865_s1 + $0x38] sm:$0xff]  ;;  %v630_v3 = vld [vmem:[%s865_s1 + $0x30] sm:$0xff]  ;;  %v629_v6 = vld [vmem:[%s865_s1 + $0x28] sm:$0xff] }
   0x2   :  { %v639_v1 = vld [vmem:[%s865_s1 + $0x78] sm:$0xff]  ;;  %245 = vmatpush.bf16.msra.mxu0 %v631_v0  ;;  %v638_v4 = vld [vmem:[%s865_s1 + $0x70] sm:$0xff]  ;;  %v637_v7 = vld [vmem:[%s865_s1 + $0x68] sm:$0xff] }
   0x3   :  { %v647_v2 = vld [vmem:[%s865_s1 + $0xb8] sm:$0xff]  ;;  %258 = vmatpush.bf16.msra.mxu1 %v639_v1  ;;  %v646_v5 = vld [vmem:[%s865_s1 + $0xb0] sm:$0xff]  ;;  %v648_v8 = vld [vmem:[%s865_s1 + $0xc0] sm:$0xff] }
   0x4   :  { %271 = vmatpush.bf16.msra.mxu2 %v647_v2  ;;  %v645_v9 = vld [vmem:[%s865_s1 + $0xa8] sm:$0xff]  ;;  %v28_v10 = vld [vmem:[%s864_s0] sm:$0xf]  ;;  %291 = vmatpush.bf16.msra.mxu3 %v648_v8  ;;  %v313_v11 = vld [vmem:[%s867_s3 + $0x38] sm:$0xf] }
   0x5   :  { %84 = vst [vmem:[#allocation1] ss:$9 sm:$0xff] %v28_v10  ;;  %v628_v12 = vld [vmem:[%s865_s1 + $0x20] sm:$0xff]  ;;  %v347_v13 = vunpack.c.l.b16 %v313_v11 }
   0x6   :  { %246 = vmatpush.bf16.msra.mxu0 %v630_v3  ;;  %v636_v14 = vld [vmem:[%s865_s1 + $0x60] sm:$0xff] }
   0x7   :  { %259 = vmatpush.bf16.msra.mxu1 %v638_v4  ;;  %v644_v15 = vld [vmem:[%s865_s1 + $0xa0] sm:$0xff]  ;;  %v355_v16 = vpack.c.b16 %v347_v13, %v347_v13 }
   0x8   :  { %272 = vmatpush.bf16.msra.mxu2 %v646_v5 }
   0xa   :  { %247 = vmatpush.bf16.msra.mxu0 %v629_v6 }
   0xb   :  { %260 = vmatpush.bf16.msra.mxu1 %v637_v7 }
   0xc   :  { %273 = vmatpush.bf16.msra.mxu2 %v645_v9 }
   0xd   :  { %12 = vsyncpa [#allocation3], 0  ;;  %vm242_vm1 = vcmask 130048   ;;  %v369_v17 = vsel %vm367_vm0, %v355_v16, 0  ;;  %v627_v18 = vld [vmem:[%s865_s1 + $0x18] sm:$0xff]  ;;  %v655_v22 = vld [vmem:[%s867_s3 + $0x30] sm:$0xff] }
   0xe   :  { %248 = vmatpush.bf16.msra.mxu0 %v628_v12  ;;  %v635_v19 = vld [vmem:[%s865_s1 + $0x58] sm:$0xff]  ;;  %371 = vmatpush.bf16.msrb.mxu3 %v369_v17  ;;  %v626_v23 = vld [vmem:[%s865_s1 + $0x10] sm:$0xff]  ;;  %v654_v26 = vld [vmem:[%s867_s3 + $0x28] sm:$0xff]  ;;  %vm438_vm2 = vcmask 1041408   ;;  %vm363_vm3 = vcmask 982016   ;;  %vm434_vm4 = vcmask 687104  }
   0xf   :  { %261 = vmatpush.bf16.msra.mxu1 %v636_v14  ;;  %v643_v20 = vld [vmem:[%s865_s1 + $0x98] sm:$0xff]  ;;  %v634_v24 = vld [vmem:[%s865_s1 + $0x50] sm:$0xff]  ;;  %v625_v27 = vld [vmem:[%s865_s1 + $0x8] sm:$0xff]  ;;  %s691_s12 = smov [#allocation2]   ;;  %s464_s15 = sshll.u32 %s871_s7, 4  ;;  %vm455_vm5 = vcmask 74752   ;;  %s465_s15 = int_to_ptr.hbm [resolvable:$true] %s464_s15 }
  0x10   :  { %274 = vmatpush.bf16.msra.mxu2 %v644_v15  ;;  %v88_v21 = vld [vmem:[#allocation1 + $0x1b] sm:$0xff]  ;;  %v642_v25 = vld [vmem:[%s865_s1 + $0x90] sm:$0xff]  ;;  %v633_v28 = vld [vmem:[%s865_s1 + $0x48] sm:$0xff]  ;;  %s462_s13 = sshll.u32 %s691_s12, 4  ;;  %s463_s13 = int_to_ptr.vmem [resolvable:$true] %s462_s13 }
  0x11   :  { %573 = vmatmul.msk.bf16.vlgmr.msra.gmra.mxu3 %vm242_vm1, %v88_v21  ;;  %v641_v29 = vld [vmem:[%s865_s1 + $0x88] sm:$0xff]  ;;  %v653_v30 = vld [vmem:[%s867_s3 + $0x20] sm:$0xff]  ;;  %v87_v36 = vld [vmem:[#allocation1 + $0x12] sm:$0xff] }
  0x12   :  { %249 = vmatpush.bf16.msra.mxu0 %v627_v18  ;;  %372 = vmatpush.bf16.msrb.mxu3 %v655_v22  ;;  %v624_v31 = vld [vmem:[%s865_s1] sm:$0xff]  ;;  %v86_v35 = vld [vmem:[#allocation1 + $0x9] sm:$0xff]  ;;  %v652_v37 = vld [vmem:[%s867_s3 + $0x18] sm:$0xff] }
  0x13   :  { %262 = vmatpush.bf16.msra.mxu1 %v635_v19  ;;  %v632_v32 = vld [vmem:[%s865_s1 + $0x40] sm:$0xff]  ;;  %v651_v38 = vld [vmem:[%s867_s3 + $0x10] sm:$0xff]  ;;  %v650_v39 = vld [vmem:[%s867_s3 + $0x8] sm:$0xff] }
  0x14   :  { %275 = vmatpush.bf16.msra.mxu2 %v643_v20  ;;  %v640_v33 = vld [vmem:[%s865_s1 + $0x80] sm:$0xff]  ;;  %v396_v41 = vld [vmem:[%s869_s5 + $0x28] sm:$0x3]  ;;  %v659_v47 = vld [vmem:[%s869_s5 + $0x18] sm:$0xff] }
  0x15   :  { %v85_v34 = vld [vmem:[#allocation1] sm:$0xff]  ;;  %v422_v42 = vunpack.c.l.b16 %v396_v41  ;;  %v658_v50 = vld [vmem:[%s869_s5 + $0x10] sm:$0xff]  ;;  %v657_v63 = vld [vmem:[%s869_s5 + $0x8] sm:$0xff] }
  0x16   :  { %250 = vmatpush.bf16.msra.mxu0 %v626_v23  ;;  %373 = vmatpush.bf16.msrb.mxu3 %v654_v26  ;;  %v649_v40 = vld [vmem:[%s867_s3] sm:$0xff] }
  0x17   :  { %263 = vmatpush.bf16.msra.mxu1 %v634_v24  ;;  %v428_v43 = vpack.c.b16 %v422_v42, %v422_v42  ;;  %v660_v46 = vld [vmem:[%s869_s5 + $0x20] sm:$0xff] }
  0x18   :  { %276 = vmatpush.bf16.msra.mxu2 %v642_v25  ;;  %v662_v48 = vld [vmem:[%s866_s2] ss:$0 sm:$0xff] }
  0x19   :  { %v440_v45 = vsel %vm438_vm2, %v428_v43, 0  ;;  %v656_v0 = vld [vmem:[%s869_s5] sm:$0xff] }
  0x1a   :  { %251 = vmatpush.bf16.msra.mxu0 %v625_v27  ;;  %374 = vmatpush.bf16.msrb.mxu3 %v653_v30  ;;  %v663_v1 = vld [vmem:[%s868_s4] ss:$0 sm:$0xff] }
  0x1b   :  { %264 = vmatpush.bf16.msra.mxu1 %v633_v28  ;;  %v664_v7 = vld [vmem:[%s870_s6] ss:$0 sm:$0xff] }
  0x1c   :  { %277 = vmatpush.bf16.msra.mxu2 %v641_v29 }
  0x1e   :  { %252 = vmatpush.bf16.msra.mxu0 %v624_v31  ;;  %375 = vmatpush.bf16.msrb.mxu3 %v652_v37 }
  0x1f   :  { %265 = vmatpush.bf16.msra.mxu1 %v632_v32 }
  0x20   :  { %278 = vmatpush.bf16.msra.mxu2 %v640_v33 }
  0x21   :  { %253 = vmatmul.bf16.vlgmr.msra.gmra.mxu0 %v85_v34 }
  0x22   :  { %266 = vmatmul.bf16.vlgmr.msra.gmra.mxu1 %v86_v35  ;;  %376 = vmatpush.bf16.msrb.mxu3 %v651_v38 }
  0x23   :  { %279 = vmatmul.bf16.vlgmr.msra.gmra.mxu2 %v87_v36  ;;  %444 = vmatpush.bf16.msrb.mxu0 %v440_v45 }
  0x26   :  { %377 = vmatpush.bf16.msrb.mxu3 %v650_v39 }
  0x27   :  { %445 = vmatpush.bf16.msrb.mxu0 %v660_v46 }
  0x2a   :  { %378 = vmatpush.bf16.msrb.mxu3 %v649_v40 }
  0x2b   :  { %446 = vmatpush.bf16.msrb.mxu0 %v659_v47 }
  0x2f   :  { %447 = vmatpush.bf16.msrb.mxu0 %v658_v50 }
  0x33   :  { %448 = vmatpush.bf16.msrb.mxu0 %v657_v63 }
  0x37   :  { %449 = vmatpush.bf16.msrb.mxu0 %v656_v0 }
  0x94   :  { %v293_v44 = vpop.f32.mrf.mxu3 }
  0x9c   :  { %v295_v49 = vpop.f32.mrf.mxu3 }
  0x9e   :  { %v254_v51 = vpop.f32.mrf.mxu0 }
  0x9f   :  { %v267_v52 = vpop.f32.mrf.mxu1  ;;  %v255_v53 = vadd.f32 %v662_v48, %v254_v51 }
  0xa1   :  { %v268_v54 = vadd.f32 %v267_v52, %v255_v53 }
  0xa6   :  { %v280_v55 = vpop.f32.mrf.mxu2  ;;  %v256_v57 = vpop.f32.mrf.mxu0 }
  0xa7   :  { %v281_v56 = vadd.f32 %v280_v55, %v268_v54  ;;  %v269_v58 = vpop.f32.mrf.mxu1 }
  0xa9   :  { %v294_v59 = vadd.f32 %v293_v44, %v281_v56 }
  0xab   :  { %v297_v60 = vmax.f32 %v294_v59, 0.0 }
  0xad   :  { %v298_v61 = vpack.c.bf16 %v297_v60, %v297_v60 }
  0xae   :  { %v282_v62 = vpop.f32.mrf.mxu2 }
  0xaf   :  { %602 = vmatmul.msk.bf16.vlgmr.msrb.gmra.mxu3 %vm363_vm3, %v298_v61 }
 0x132   :  { %v380_v2 = vpop.f32.mrf.mxu3 }
 0x133   :  { %v381_v3 = vadd.f32 %v663_v1, %v380_v2 }
 0x135   :  { %v384_v4 = vmax.f32 %v381_v3, 0.0 }
 0x137   :  { %v385_v5 = vpack.c.bf16 %v384_v4, %v384_v4 }
 0x139   :  { %623 = vmatmul.msk.bf16.vlgmr.msrb.gmra.mxu0 %vm434_vm4, %v385_v5 }
 0x13a   :  { %v382_v6 = vpop.f32.mrf.mxu3 }
 0x1b6   :  { %v451_v8 = vpop.f32.mrf.mxu0 }
 0x1b7   :  { %v452_v9 = vadd.f32 %v664_v7, %v451_v8 }
 0x1b9   :  { %456 = vst.msk [vmem:[#allocation2] sm:$0x3] %vm455_vm5, %v452_v9 }
 0x1ba   :  { %467 = dma.vmem_to_hbm [thread:$0]  %s463_s13, 32, %s465_s15, [#allocation3]  }
 0x1be   :  { %v453_v10 = vpop.f32.mrf.mxu0 }
 0x1bf   :  { %689 = dma.done.wait [#allocation3], 32  }
 0x1c0   :  { %690 = vsyncadd [#allocation3], 4294967264 }
 0x1c1   :  { %472 = vsyncpa [#allocation3], 1 }

</bundles_post_ra>
